<compile_context>
chip_gen: v7x
topology: tpu7x:2x2x1
jax: 0.10.0
libtpu: 0.0.40
codegen_flags: <defaults>
</compile_context>

<pallas_src>
import functools

import jax
import jax.numpy as jnp
from jax.experimental import pallas as pl
from jax.experimental.pallas import tpu as pltpu

_EPS = 1e-5


def _round_up(x, m):
    return (x + m - 1) // m * m


def _vmem_capacity_bytes():
    """Per-generation VMEM capacity (v7x has 64 MiB vs 128 MiB on v5e/v6e)."""
    try:
        cap = getattr(pltpu.get_tpu_info(), "vmem_capacity_bytes", None)
        if cap:
            return int(cap)
    except Exception:
        pass
    return 64 * 1024 * 1024  # conservative fallback (v7x)


# --------------------- pass 1: conv matmul + partial BN stats ----------------
def _conv_stats_kernel(x_ref, w_ref, y_ref, ssum_ref, ssq_ref):
    """One pixel-tile of the channels-on-sublane conv matmul + channel sums.

    x_ref   : (Kp, TP)      im2col panel (pixels on lanes)   (bf16 or f32)
    w_ref   : (Cout_p, Kp)  reshaped conv weight             (same dtype)
    y_ref   : (Cout_p, TP)  conv output tile                 (f32)
    ssum_ref: (Cout_p, 1)   sum(y)   over this tile's pixels (f32)
    ssq_ref : (Cout_p, 1)   sum(y*y) over this tile's pixels (f32)
    """
    y = jnp.dot(w_ref[...], x_ref[...], preferred_element_type=jnp.float32)
    y_ref[...] = y
    ssum_ref[...] = jnp.sum(y, axis=1, keepdims=True)
    ssq_ref[...] = jnp.sum(y * y, axis=1, keepdims=True)


# --------------------- pass 2: fused BN affine + ReLU ------------------------
def _bn_relu_kernel(y_ref, scale_ref, shift_ref, out_ref):
    # (Cout_p, TP) * (Cout_p, 1) + (Cout_p, 1): one VPU FMA + max per element.
    out_ref[...] = jnp.maximum(y_ref[...] * scale_ref[...] + shift_ref[...], 0.0)


@functools.partial(jax.jit, static_argnames=("matmul_dtype",))
def encoder_block(x_nchw, w_oihw, b, gamma, beta, *, matmul_dtype=jnp.bfloat16):
    """NCHW in / NCHW out, matching the PyTorch _EncoderBlock forward."""
    del b  # Conv bias cancels exactly under training-mode BatchNorm.
    N, Cin, H, W = x_nchw.shape
    Cout, _, KH, KW = w_oihw.shape

    P = H * W                              # pixels per image
    R = N * P                              # total output pixels
    K = Cin * KH * KW                      # im2col contraction length
    in_bytes = jnp.dtype(matmul_dtype).itemsize
    sub = 16 if in_bytes == 2 else 8       # sublane packing granularity
    Kp = _round_up(K, sub)                 # contraction, sublane-aligned only
    Cp = _round_up(Cout, 8)                # output channels on sublanes

    # ---- pixel tile: multiple of 128 lanes, as big as VMEM comfortably allows.
    vmem_cap = _vmem_capacity_bytes()
    denom = 2 * (Kp * in_bytes + Cp * 4)   # double-buffered bytes per pixel
    tp_cap = max(128, int(0.4 * vmem_cap) // denom)
    TP = max(128, min(_round_up(P, 128), (tp_cap // 128) * 128, 8192))
    Pp = _round_up(P, TP)
    num_pt = Pp // TP
    # Note: total grid points = N * num_pt; keep it even for v7x megacore balance
    # (true for the default N=2 test case).

    step_bytes = denom * TP + Cp * Kp * in_bytes
    vmem_limit = int(min(max(4 * step_bytes, 32 * 1024 * 1024),
                         int(0.75 * vmem_cap)))

    # ---- im2col in the wrapper (K index order = c*9 + ky*3 + kx, pixel = h*W+w).
    # Cast to matmul dtype BEFORE building patches so the 9x expansion is half-width.
    # TODO(synk): replace with in-kernel halo-DMA im2col for production sizes.
    x_q = x_nchw.astype(matmul_dtype)
    xp = jnp.pad(x_q, ((0, 0), (0, 0), (1, 1), (1, 1)))          # pad=1 (H, W)
    patches = [xp[:, :, ky:ky + H, kx:kx + W]
               for ky in range(KH) for kx in range(KW)]
    x_col = jnp.stack(patches, axis=2).reshape(N, K, P)          # (N, K, H*W)
    x_col = jnp.pad(x_col, ((0, 0), (0, Kp - K), (0, Pp - P)))

    # weight (O,I,KH,KW) -> (Cout, K) with matching K order -> padded (Cp, Kp)
    w_mat = w_oihw.astype(matmul_dtype).reshape(Cout, K)
    w_mat = jnp.pad(w_mat, ((0, Cp - Cout), (0, Kp - K)))

    # ---- pass 1: tiled conv matmul + per-tile channel sum / sum-of-squares.
    flops1 = 2 * R * K * Cout
    bytes1 = (N * Kp * Pp * in_bytes + Cp * Kp * in_bytes
              + N * Cp * Pp * 4 + 2 * N * num_pt * Cp * 4)
    y, ssum, ssq = pl.pallas_call(
        _conv_stats_kernel,
        out_shape=(jax.ShapeDtypeStruct((N, Cp, Pp), jnp.float32),
                   jax.ShapeDtypeStruct((N, num_pt, Cp, 1), jnp.float32),
                   jax.ShapeDtypeStruct((N, num_pt, Cp, 1), jnp.float32)),
        grid=(N, num_pt),
        in_specs=[pl.BlockSpec((None, Kp, TP), lambda n, j: (n, 0, j)),
                  pl.BlockSpec((Cp, Kp), lambda n, j: (0, 0))],
        out_specs=(pl.BlockSpec((None, Cp, TP), lambda n, j: (n, 0, j)),
                   pl.BlockSpec((None, None, Cp, 1), lambda n, j: (n, j, 0, 0)),
                   pl.BlockSpec((None, None, Cp, 1), lambda n, j: (n, j, 0, 0))),
        compiler_params=pltpu.CompilerParams(
            dimension_semantics=("parallel", "parallel"),
            vmem_limit_bytes=vmem_limit),
        cost_estimate=pl.CostEstimate(flops=flops1, transcendentals=0,
                                      bytes_accessed=bytes1),
    )(x_col, w_mat)

    # ---- per-channel scale / shift (tiny, plain XLA).  Zero-padded pixels and
    # channels contribute 0 to sum/sumsq; true element count R is used, so the
    # batch statistics are exact.
    count = jnp.float32(R)
    mean = jnp.sum(ssum, axis=(0, 1)) / count                    # (Cp, 1)
    ex2 = jnp.sum(ssq, axis=(0, 1)) / count                      # (Cp, 1)
    var = jnp.maximum(ex2 - mean * mean, 0.0)                    # biased variance
    gamma_p = jnp.pad(gamma.astype(jnp.float32), (0, Cp - Cout)).reshape(Cp, 1)
    beta_p = jnp.pad(beta.astype(jnp.float32), (0, Cp - Cout)).reshape(Cp, 1)
    scale = gamma_p * jax.lax.rsqrt(var + _EPS)                  # (Cp, 1)
    shift = beta_p - mean * scale                                # (Cp, 1)

    # ---- pass 2: fused normalize + ReLU over the same lane-dense pixel tiles.
    flops2 = 2 * N * Cp * Pp
    bytes2 = 2 * N * Cp * Pp * 4 + 2 * Cp * 4
    out_full = pl.pallas_call(
        _bn_relu_kernel,
        out_shape=jax.ShapeDtypeStruct((N, Cp, Pp), jnp.float32),
        grid=(N, num_pt),
        in_specs=[pl.BlockSpec((None, Cp, TP), lambda n, j: (n, 0, j)),
                  pl.BlockSpec((Cp, 1), lambda n, j: (0, 0)),
                  pl.BlockSpec((Cp, 1), lambda n, j: (0, 0))],
        out_specs=pl.BlockSpec((None, Cp, TP), lambda n, j: (n, 0, j)),
        compiler_params=pltpu.CompilerParams(
            dimension_semantics=("parallel", "parallel"),
            vmem_limit_bytes=vmem_limit),
        cost_estimate=pl.CostEstimate(flops=flops2, transcendentals=0,
                                      bytes_accessed=bytes2),
    )(y, scale, shift)

    # (N, Cp, Pp) -> NCHW is a slice (no-op when no padding) + free reshape.
    return out_full[:, :Cout, :P].reshape(N, Cout, H, W)


def _reference(x, w, b, gamma, beta):
    """Pure-JAX reference (same semantics) for a correctness check."""
    y = jax.lax.conv_general_dilated(
        x, w, window_strides=(1, 1), padding=((1, 1), (1, 1)),
        dimension_numbers=("NCHW", "OIHW", "NCHW"))
    y = y + b[None, :, None, None]
    mean = jnp.mean(y, axis=(0, 2, 3), keepdims=True)
    var = jnp.mean((y - mean) ** 2, axis=(0, 2, 3), keepdims=True)
    yn = (y - mean) * jax.lax.rsqrt(var + _EPS) \
         * gamma[None, :, None, None] + beta[None, :, None, None]
    return jnp.maximum(yn, 0.0)


if __name__ == "__main__":
    # _EncoderBlock(in_channels=4, out_channels=8, kernel_size=3)
    N, Cin, H, W = 2, 4, 16, 16
    Cout, Kk = 8, 3

    key = jax.random.PRNGKey(0)
    kx, kw, kb, kg, kbe = jax.random.split(key, 5)

    x = jax.random.normal(kx, (N, Cin, H, W), jnp.float32)
    w = jax.random.normal(kw, (Cout, Cin, Kk, Kk), jnp.float32) * 0.1   # OIHW
    b = jax.random.normal(kb, (Cout,), jnp.float32) * 0.1               # Conv bias
    gamma = 1.0 + 0.1 * jax.random.normal(kg, (Cout,), jnp.float32)     # BN weight
    beta = 0.1 * jax.random.normal(kbe, (Cout,), jnp.float32)           # BN bias

    ref = _reference(x, w, b, gamma, beta)

    # Default: bf16 MXU operands (fast path on v5e/v6e/v7x), f32 accum + BN math.
    out_bf16 = jax.block_until_ready(encoder_block(x, w, b, gamma, beta))
    assert out_bf16.shape == (N, Cout, H, W)
    assert jnp.allclose(out_bf16, ref, rtol=5e-2, atol=5e-2), \
        "bf16 mismatch vs reference"

    # f32 MXU operands: bit-accurate path, tight tolerance.
    out_f32 = jax.block_until_ready(
        encoder_block(x, w, b, gamma, beta, matmul_dtype=jnp.float32))
    assert jnp.allclose(out_f32, ref, rtol=1e-4, atol=1e-4), \
        "f32 mismatch vs reference"

    print("KERNEL_OK")
</pallas_src>

<mosaic_0001>
module attributes {stable_mosaic.version = 11 : i64} {
  func.func @_conv_stats_kernel(%arg0: i32, %arg1: i32, %arg2: memref<1x48x256xbf16, #tpu.memory_space<vmem>>, %arg3: memref<8x48xbf16, #tpu.memory_space<vmem>>, %arg4: memref<1x8x256xf32, #tpu.memory_space<vmem>>, %arg5: memref<1x1x8x1xf32, #tpu.memory_space<vmem>>, %arg6: memref<1x1x8x1xf32, #tpu.memory_space<vmem>>) attributes {dimension_semantics = [#tpu.dimension_semantics<parallel>, #tpu.dimension_semantics<parallel>], iteration_bounds = array<i64: 2, 1>, scalar_prefetch = 0 : i64, scratch_operands = 0 : i64, tpu.core_type = #tpu.core_type<tc>, window_params = [{transform_indices = @transform_0, window_bounds = array<i64: 1, 48, 256>}, {pipeline_mode = #tpu.pipeline_mode<synchronous>, transform_indices = @transform_1, window_bounds = array<i64: 8, 48>}, {transform_indices = @transform_2, window_bounds = array<i64: 1, 8, 256>}, {transform_indices = @transform_3, window_bounds = array<i64: 1, 1, 8, 1>}, {transform_indices = @transform_4, window_bounds = array<i64: 1, 1, 8, 1>}]} {
    %c0 = arith.constant 0 : index
    %c0_0 = arith.constant 0 : index
    %0 = vector.load %arg3[%c0, %c0_0] : memref<8x48xbf16, #tpu.memory_space<vmem>>, vector<8x48xbf16>
    %c0_1 = arith.constant 0 : index
    %c0_2 = arith.constant 0 : index
    %c0_3 = arith.constant 0 : index
    %1 = vector.load %arg2[%c0_1, %c0_2, %c0_3] : memref<1x48x256xbf16, #tpu.memory_space<vmem>>, vector<1x48x256xbf16>
    %2 = vector.shape_cast %1 : vector<1x48x256xbf16> to vector<48x256xbf16>
    %cst = arith.constant dense<0.000000e+00> : vector<8x256xf32>
    %3 = tpu.matmul %0, %2, %cst {dimension_numbers = #tpu.dot_dimension_numbers<[1], [0], [0], [1], [0, 0, 1, 1], [], []>} : vector<8x48xbf16>, vector<48x256xbf16>, vector<8x256xf32> -> vector<8x256xf32>
    %c0_4 = arith.constant 0 : index
    %c0_5 = arith.constant 0 : index
    %c0_6 = arith.constant 0 : index
    %4 = vector.load %arg4[%c0_4, %c0_5, %c0_6] : memref<1x8x256xf32, #tpu.memory_space<vmem>>, vector<1x8x256xf32>
    %5 = vector.shape_cast %4 : vector<1x8x256xf32> to vector<8x256xf32>
    %6 = vector.shape_cast %3 : vector<8x256xf32> to vector<1x8x256xf32>
    tpu.vector_store %arg4[%c0_4, %c0_5, %c0_6], %6 {strides = array<i32>} : memref<1x8x256xf32, #tpu.memory_space<vmem>>, vector<1x8x256xf32>,
    %cst_7 = arith.constant dense<0.000000e+00> : vector<8xf32>
    %7 = vector.multi_reduction <add>, %3, %cst_7 [1] : vector<8x256xf32> to vector<8xf32>
    %8 = vector.shape_cast %7 : vector<8xf32> to vector<8x1xf32>
    %c0_8 = arith.constant 0 : index
    %c0_9 = arith.constant 0 : index
    %c0_10 = arith.constant 0 : index
    %c0_11 = arith.constant 0 : index
    %9 = vector.load %arg5[%c0_8, %c0_9, %c0_10, %c0_11] : memref<1x1x8x1xf32, #tpu.memory_space<vmem>>, vector<1x1x8x1xf32>
    %10 = vector.shape_cast %9 : vector<1x1x8x1xf32> to vector<8x1xf32>
    %11 = vector.shape_cast %8 : vector<8x1xf32> to vector<1x1x8x1xf32>
    tpu.vector_store %arg5[%c0_8, %c0_9, %c0_10, %c0_11], %11 {strides = array<i32>} : memref<1x1x8x1xf32, #tpu.memory_space<vmem>>, vector<1x1x8x1xf32>,
    %12 = arith.mulf %3, %3 : vector<8x256xf32>
    %cst_12 = arith.constant dense<0.000000e+00> : vector<8xf32>
    %13 = vector.multi_reduction <add>, %12, %cst_12 [1] : vector<8x256xf32> to vector<8xf32>
    %14 = vector.shape_cast %13 : vector<8xf32> to vector<8x1xf32>
    %c0_13 = arith.constant 0 : index
    %c0_14 = arith.constant 0 : index
    %c0_15 = arith.constant 0 : index
    %c0_16 = arith.constant 0 : index
    %15 = vector.load %arg6[%c0_13, %c0_14, %c0_15, %c0_16] : memref<1x1x8x1xf32, #tpu.memory_space<vmem>>, vector<1x1x8x1xf32>
    %16 = vector.shape_cast %15 : vector<1x1x8x1xf32> to vector<8x1xf32>
    %17 = vector.shape_cast %14 : vector<8x1xf32> to vector<1x1x8x1xf32>
    tpu.vector_store %arg6[%c0_13, %c0_14, %c0_15, %c0_16], %17 {strides = array<i32>} : memref<1x1x8x1xf32, #tpu.memory_space<vmem>>, vector<1x1x8x1xf32>,
    return
  }
  func.func @transform_0(%arg0: i32, %arg1: i32) -> (i32, i32, i32) {
    %c0_i32 = arith.constant 0 : i32
    %c0_i32_0 = arith.constant 0 : i32
    return %arg0, %c0_i32, %arg1 : i32, i32, i32
  }
  func.func @transform_1(%arg0: i32, %arg1: i32) -> (i32, i32) {
    %c0_i32 = arith.constant 0 : i32
    %c0_i32_0 = arith.constant 0 : i32
    %c0_i32_1 = arith.constant 0 : i32
    return %c0_i32, %c0_i32_0 : i32, i32
  }
  func.func @transform_2(%arg0: i32, %arg1: i32) -> (i32, i32, i32) {
    %c0_i32 = arith.constant 0 : i32
    %c0_i32_0 = arith.constant 0 : i32
    return %arg0, %c0_i32, %arg1 : i32, i32, i32
  }
  func.func @transform_3(%arg0: i32, %arg1: i32) -> (i32, i32, i32, i32) {
    %c0_i32 = arith.constant 0 : i32
    %c0_i32_0 = arith.constant 0 : i32
    %c0_i32_1 = arith.constant 0 : i32
    return %arg0, %arg1, %c0_i32, %c0_i32_0 : i32, i32, i32, i32
  }
  func.func @transform_4(%arg0: i32, %arg1: i32) -> (i32, i32, i32, i32) {
    %c0_i32 = arith.constant 0 : i32
    %c0_i32_0 = arith.constant 0 : i32
    %c0_i32_1 = arith.constant 0 : i32
    return %arg0, %arg1, %c0_i32, %c0_i32_0 : i32, i32, i32, i32
  }
}

module attributes {stable_mosaic.version = 11 : i64} {
  func.func @_bn_relu_kernel(%arg0: i32, %arg1: i32, %arg2: memref<1x8x256xf32, #tpu.memory_space<vmem>>, %arg3: memref<8x1xf32, #tpu.memory_space<vmem>>, %arg4: memref<8x1xf32, #tpu.memory_space<vmem>>, %arg5: memref<1x8x256xf32, #tpu.memory_space<vmem>>) attributes {dimension_semantics = [#tpu.dimension_semantics<parallel>, #tpu.dimension_semantics<parallel>], iteration_bounds = array<i64: 2, 1>, scalar_prefetch = 0 : i64, scratch_operands = 0 : i64, tpu.core_type = #tpu.core_type<tc>, window_params = [{transform_indices = @transform_0, window_bounds = array<i64: 1, 8, 256>}, {pipeline_mode = #tpu.pipeline_mode<synchronous>, transform_indices = @transform_1, window_bounds = array<i64: 8, 1>}, {pipeline_mode = #tpu.pipeline_mode<synchronous>, transform_indices = @transform_2, window_bounds = array<i64: 8, 1>}, {transform_indices = @transform_3, window_bounds = array<i64: 1, 8, 256>}]} {
    %c0 = arith.constant 0 : index
    %c0_0 = arith.constant 0 : index
    %c0_1 = arith.constant 0 : index
    %0 = vector.load %arg2[%c0, %c0_0, %c0_1] : memref<1x8x256xf32, #tpu.memory_space<vmem>>, vector<1x8x256xf32>
    %1 = vector.shape_cast %0 : vector<1x8x256xf32> to vector<8x256xf32>
    %c0_2 = arith.constant 0 : index
    %c0_3 = arith.constant 0 : index
    %2 = vector.load %arg3[%c0_2, %c0_3] : memref<8x1xf32, #tpu.memory_space<vmem>>, vector<8x1xf32>
    %3 = vector.broadcast %2 : vector<8x1xf32> to vector<8x256xf32>
    %4 = arith.mulf %1, %3 : vector<8x256xf32>
    %c0_4 = arith.constant 0 : index
    %c0_5 = arith.constant 0 : index
    %5 = vector.load %arg4[%c0_4, %c0_5] : memref<8x1xf32, #tpu.memory_space<vmem>>, vector<8x1xf32>
    %6 = vector.broadcast %5 : vector<8x1xf32> to vector<8x256xf32>
    %7 = arith.addf %4, %6 : vector<8x256xf32>
    %cst = arith.constant 0.000000e+00 : f32
    %8 = vector.broadcast %cst : f32 to vector<8x256xf32>
    %9 = arith.maximumf %7, %8 : vector<8x256xf32>
    %c0_6 = arith.constant 0 : index
    %c0_7 = arith.constant 0 : index
    %c0_8 = arith.constant 0 : index
    %10 = vector.load %arg5[%c0_6, %c0_7, %c0_8] : memref<1x8x256xf32, #tpu.memory_space<vmem>>, vector<1x8x256xf32>
    %11 = vector.shape_cast %10 : vector<1x8x256xf32> to vector<8x256xf32>
    %12 = vector.shape_cast %9 : vector<8x256xf32> to vector<1x8x256xf32>
    tpu.vector_store %arg5[%c0_6, %c0_7, %c0_8], %12 {strides = array<i32>} : memref<1x8x256xf32, #tpu.memory_space<vmem>>, vector<1x8x256xf32>,
    return
  }
  func.func @transform_0(%arg0: i32, %arg1: i32) -> (i32, i32, i32) {
    %c0_i32 = arith.constant 0 : i32
    %c0_i32_0 = arith.constant 0 : i32
    return %arg0, %c0_i32, %arg1 : i32, i32, i32
  }
  func.func @transform_1(%arg0: i32, %arg1: i32) -> (i32, i32) {
    %c0_i32 = arith.constant 0 : i32
    %c0_i32_0 = arith.constant 0 : i32
    %c0_i32_1 = arith.constant 0 : i32
    return %c0_i32, %c0_i32_0 : i32, i32
  }
  func.func @transform_2(%arg0: i32, %arg1: i32) -> (i32, i32) {
    %c0_i32 = arith.constant 0 : i32
    %c0_i32_0 = arith.constant 0 : i32
    %c0_i32_1 = arith.constant 0 : i32
    return %c0_i32, %c0_i32_0 : i32, i32
  }
  func.func @transform_3(%arg0: i32, %arg1: i32) -> (i32, i32, i32) {
    %c0_i32 = arith.constant 0 : i32
    %c0_i32_0 = arith.constant 0 : i32
    return %arg0, %c0_i32, %arg1 : i32, i32, i32
  }
}

</mosaic_0001>

<bundles_post_ra>
// kernel: encoder_block.3
= control target key start
LH: loop header
LB: loop body
LE: loop exit
PB: predicated region body
PF: predicated region fallthrough
CT: control target
= control target key end

     0   :  { %s403_s12 = smov 0   ;;  %s405_s13 = smov 0   ;;  %s442_s0 = inlined_call_operand.vmem [shape: f32[2,8,256], index: 0, kind: input, shape index: {}]   ;;  %s443_s1 = inlined_call_operand.vmem [shape: f32[8,1], index: 1, kind: input, shape index: {}]   ;;  %s444_s2 = inlined_call_operand.vmem [shape: f32[8,1], index: 2, kind: input, shape index: {}]   ;;  %s445_s3 = inlined_call_operand.vmem [shape: f32[2,8,256], index: 3, kind: output, shape index: {}]  }
   0x1   :  { %s407_s14 = smov 0  }
   0x2 LB: > { %s25_s15 = sadd.s32 1, %s376_s13  ;;  %p323_p0 = scmp.ge.s32.totalorder %s380_s14, 1  ;;  %s380_s14 = sphi %s407_s14, %s13_s14   ;;  %s376_s13 = sphi %s405_s13, %s447_s13   ;;  %s372_s12 = sphi %s403_s12, %s446_s12  }
   0x3   : > { %p27_p1 = scmp.ge.s32.totalorder %s25_s15, 2  ;;  %p158_p2 = scmp.lt.s32.totalorder %s380_s14, 3 }
   0x5   : > { %s449_s15 = smov (%p27_p1, %s25_s15), 0  ;;  %p159_p3 = pnand %p323_p0, %p158_p2 }
   0x6   : > { %v212_v0 = vld [vmem:[%s443_s1] sm:$0xff] (!%p159_p3)  ;;  %v382_v1 = vmov (!%p159_p3), 0   ;;  %p191_p4 = scmp.lt.s32.totalorder (!%p159_p3), %s372_s12, 1 }
   0x7   : > { %162 = sbr.rel (%p159_p3) target bundleno = 145 (0x91), region = 32  ;;  %357 = vset.pattern.permute.xlu0 (!%p159_p3), %v382_v1  ;;  %v220_v2 = vld [vmem:[%s444_s2] sm:$0xff] (!%p159_p3) }
   0x8   : > { %215 = vperm.xlu0 (!%p159_p3), %357, %v212_v0  }
   0xc   : > { %223 = vperm.xlu0 (!%p159_p3), %357, %v220_v2  }
   0xe   : > { %s451_s12 = smov (!%p191_p4, %s372_s12), 1 }
   0xf   : > { %s330_s20 = sshll.u32 %s451_s12, 4 }
  0x10   : > { %s198_s23 = scalar_lea.vmem %s442_s0, %s330_s20  ;;  %s208_s26 = scalar_lea.vmem %s445_s3, %s330_s20 }
  0x11   : > { %v210_v4 = vld [vmem:[%s198_s23] sm:$0xff]  ;;  %v211_v5 = vld [vmem:[%s198_s23 + $0x8] sm:$0xff] }
  0x87   : > { %v216_v3 = vpop.permute.xlu0 %215 }
  0x88   : > { %v218_v6 = vmul.f32 %v216_v3, %v210_v4  ;;  %v219_v7 = vmul.f32 %v216_v3, %v211_v5 }
  0x8b   : > { %v224_v8 = vpop.permute.xlu0 %223 }
  0x8c   : > { %v226_v9 = vadd.f32 %v224_v8, %v218_v6  ;;  %v227_v10 = vadd.f32 %v224_v8, %v219_v7 }
  0x8e   : > { %v228_v11 = vmax.f32 %v226_v9, 0.0  ;;  %v229_v12 = vmax.f32 %v227_v10, 0.0 }
  0x90   : > { %230 = vst [vmem:[%s208_s26] sm:$0xff] %v228_v11  ;;  %231 = vst [vmem:[%s208_s26 + $0x8] sm:$0xff] %v229_v12 }
  0x91 PF: > { %s13_s14 = sadd.s32 1, %s380_s14   ;;  %s446_s12 = smov %s376_s13 }
  0x92   : > { %p10_p5 = scmp.ge.s32.totalorder %s13_s14, 4   ;;  %s447_s13 = smov %s449_s15 }
  0x94   :  { %12 = sbr.rel (!%p10_p5) target bundleno = 2 (0x2), region = 62 }

// kernel: encoder_block.2
= control target key start
LH: loop header
LB: loop body
LE: loop exit
PB: predicated region body
PF: predicated region fallthrough
CT: control target
= control target key end

     0   :  { %s644_s15 = smov 0   ;;  %s646_s16 = smov 0   ;;  %s691_s0 = inlined_call_operand.vmem [shape: bf16[2,48,256], index: 0, kind: input, shape index: {}]   ;;  %s692_s1 = inlined_call_operand.vmem [shape: bf16[8,48], index: 1, kind: input, shape index: {}]   ;;  %s693_s2 = inlined_call_operand.vmem [shape: f32[2,8,256], index: 2, kind: output, shape index: {0}]   ;;  %s694_s3 = inlined_call_operand.vmem [shape: f32[2,1,8,1], index: 3, kind: output, shape index: {1}]   ;;  %s695_s4 = inlined_call_operand.vmem [shape: f32[2,1,8,1], index: 4, kind: output, shape index: {2}]  }
   0x1   :  { %s648_s17 = smov 0  }
   0x2 LB: > { %s27_s18 = sadd.s32 1, %s612_s16  ;;  %p543_p0 = scmp.ge.s32.totalorder %s616_s17, 1  ;;  %s616_s17 = sphi %s648_s17, %s15_s17   ;;  %s612_s16 = sphi %s646_s16, %s697_s16   ;;  %s608_s15 = sphi %s644_s15, %s696_s15  }
   0x3   : > { %p29_p1 = scmp.ge.s32.totalorder %s27_s18, 2  ;;  %p192_p2 = scmp.lt.s32.totalorder %s616_s17, 3 }
   0x5   : > { %s699_s18 = smov (%p29_p1, %s27_s18), 0  ;;  %p193_p3 = pnand %p543_p0, %p192_p2 }
   0x6   : > { %p241_p4 = scmp.lt.s32.totalorder (!%p193_p3), %s608_s15, 1  ;;  %v618_v0 = vmov (!%p193_p3), 0   ;;  %v275_v7 = vld [vmem:[%s692_s1] sm:$0xf] (!%p193_p3)  ;;  %vm312_vm0 = vcmask (!%p193_p3), 392192   ;;  %vm362_vm1 = vcmask (!%p193_p3), 7168  }
   0x7   : > { %196 = sbr.rel (%p193_p3) target bundleno = 393 (0x189), region = 28  ;;  %348 = vmatprep.mubr.bf16.mxu0 (!%p193_p3), %v618_v0 }
   0xe   : > { %s701_s15 = smov (!%p241_p4, %s608_s15), 1 }
   0xf   : > { %s559_s19 = smul.u32 48, %s701_s15  ;;  %s558_s25 = sshll.u32 %s701_s15, 4 }
  0x10   : > { %s258_s28 = scalar_lea.vmem %s693_s2, %s558_s25  ;;  %s547_s29 = sshll.u32 %s701_s15, 3 }
  0x11   : > { %s248_s22 = scalar_lea.vmem %s691_s0, %s559_s19  ;;  %s266_s6 = scalar_lea.vmem %s694_s3, %s547_s29 }
  0x12   : > { %v585_v1 = vld [vmem:[%s248_s22 + $0x4] ss:$8 sps:$4 sm:$0xff]   ;;  %v587_v2 = vld [vmem:[%s248_s22] ss:$8 sps:$4 sm:$0xff]   ;;  %v588_v3 = vld [vmem:[%s248_s22 + $0x14] ss:$8 sps:$4 sm:$0xff]   ;;  %s273_s9 = scalar_lea.vmem %s695_s4, %s547_s29 }
  0x13   : > { %316 = vmatprep.subr.bf16.mxu0 %v585_v1  ;;  %v590_v4 = vld [vmem:[%s248_s22 + $0x10] ss:$8 sps:$4 sm:$0xff]   ;;  %v591_v5 = vld [vmem:[%s248_s22 + $0x24] ss:$8 sps:$4 sm:$0xff]   ;;  %v593_v6 = vld [vmem:[%s248_s22 + $0x20] ss:$8 sps:$4 sm:$0xff]  }
  0x14   : > { %317 = vmatpush1.bf16.msra.mxu0 %v587_v2 }
  0x15   : > { %318 = vmatprep.subr.bf16.mxu0 %v588_v3 }
  0x18   : > { %319 = vmatpush1.bf16.msra.mxu0 %v590_v4 }
  0x19   : > { %320 = vmatprep.subr.bf16.mxu0 %v591_v5 }
  0x1c   : > { %321 = vmatpush1.bf16.msra.mxu0 %v593_v6 }
  0x1f   : > { %555 = vmatmul.mubr.msk.bf16.vlgmr.msra.gmra.mrb[0].mxu0 %vm312_vm0, %v275_v7 }
  0xf2   : > { %v350_v8 = vpop.f32.mrb[0].mxu0 }
  0xf3   : > { %357 = vst [vmem:[%s258_s28] sm:$0xff] %v350_v8  ;;  %v352_v9 = vpop.f32.mrb[1].mxu0  ;;  %v364_v10 = vmul.f32 %v350_v8, %v350_v8 }
  0xf4   : > { %358 = vst [vmem:[%s258_s28 + $0x8] sm:$0xff] %v352_v9  ;;  %v354_v11 = vpop.f32.mrb[2].mxu0  ;;  %v359_v12 = vadd.f32 %v352_v9, %v350_v8  ;;  %v365_v13 = vmul.f32 %v352_v9, %v352_v9 }
  0xf5   : > { %v355_v14 = vpop.f32.mrb[3].mxu0 }
  0xf6   : > { %360 = vadd.xlane.f32.xlu0 %v359_v12  ;;  %v366_v15 = vadd.f32 %v365_v13, %v364_v10 }
  0xfa   : > { %367 = vadd.xlane.f32.xlu0 %v366_v15 }
 0x183   : > { %v361_v16 = vpop.xlane.xlu0 %360 }
 0x184   : > { %363 = vst.msk [vmem:[%s266_s6] sm:$0xff] %vm362_vm1, %v361_v16 }
 0x187   : > { %v368_v17 = vpop.xlane.xlu0 %367 }
 0x188   : > { %369 = vst.msk [vmem:[%s273_s9] sm:$0xff] %vm362_vm1, %v368_v17 }
 0x189 PF: > { %s15_s17 = sadd.s32 1, %s616_s17   ;;  %s696_s15 = smov %s612_s16 }
 0x18a   : > { %p12_p5 = scmp.ge.s32.totalorder %s15_s17, 4   ;;  %s697_s16 = smov %s699_s18 }
 0x18c   :  { %14 = sbr.rel (!%p12_p5) target bundleno = 2 (0x2), region = 82 }

</bundles_post_ra>
